<compile_context>
chip_gen: v5e
topology: v5e:2x2
jax: 0.10.0
libtpu: 0.0.40
codegen_flags: <defaults>
</compile_context>

<pallas_src>
import jax
import jax.numpy as jnp
from jax.experimental import pallas as pl
from jax.experimental.pallas import tpu as pltpu


_SMALL_N = 4096  # below this, one full-array block is optimal (production case)


def _sigmoid_kernel(p_ref, o_ref):
    # sigmoid(x) == 0.5 * (tanh(0.5 * x) + 1): single EUP push + fused mul-add
    # on the VPU; keeps vector-ALU slots free.  Computed in f32 for v5e safety.
    x = p_ref[...].astype(jnp.float32)
    o_ref[...] = (0.5 * (jnp.tanh(0.5 * x) + 1.0)).astype(o_ref.dtype)


def _cost(n_elems, itemsize):
    return pl.CostEstimate(
        flops=3 * n_elems,
        transcendentals=n_elems,
        bytes_accessed=2 * itemsize * n_elems,
    )


def _round_up(x, m):
    return ((x + m - 1) // m) * m


def propensity_forward(propensity_param: jax.Array) -> jax.Array:
    """Pallas equivalent of PropensityModel.forward(): sigmoid(parameter)."""
    rows, n = propensity_param.shape  # (1, list_size + 1)
    dtype = propensity_param.dtype
    itemsize = jnp.dtype(dtype).itemsize
    n_elems = rows * n

    # ---- Small-shape fast path (production: list_size is O(10)) -----------
    # Single full-array block (legal regardless of (8,128) since block == dims).
    if n_elems <= _SMALL_N:
        return pl.pallas_call(
            _sigmoid_kernel,
            out_shape=jax.ShapeDtypeStruct((rows, n), dtype),
            grid=(1,),
            in_specs=[pl.BlockSpec((rows, n), lambda i: (0, 0))],
            out_specs=pl.BlockSpec((rows, n), lambda i: (0, 0)),
            cost_estimate=_cost(n_elems, itemsize),
        )(propensity_param)

    # ---- Large-shape path ---------------------------------------------------
    # rows == 1 here, so a (1, n) tiling would leave 7/8 sublanes idle.  View
    # the contiguous parameter as a 2-D (R, LANE) slab instead (row-major
    # reshape: pure layout bitcast, no extra HBM pass).
    lane = 0
    for cand in (512, 256, 128):
        if n_elems % cand == 0:
            lane = cand
            break

    if lane == 0:
        # Width not a multiple of 128: fall back to lane-blocked (1, tile)
        # tiles with a pl.cdiv grid; Pallas masks the ragged last block
        # (no host-side pad/slice passes).
        tile = 512
        return pl.pallas_call(
            _sigmoid_kernel,
            out_shape=jax.ShapeDtypeStruct((rows, n), dtype),
            grid=(pl.cdiv(n, tile),),
            in_specs=[pl.BlockSpec((rows, tile), lambda i: (0, i))],
            out_specs=pl.BlockSpec((rows, tile), lambda i: (0, i)),
            compiler_params=pltpu.CompilerParams(
                dimension_semantics=("parallel",)),
            cost_estimate=_cost(n_elems, itemsize),
        )(propensity_param)

    r = n_elems // lane
    x2d = propensity_param.reshape(r, lane)
    # Sublane block: multiple of 8, capped at 512 rows (block <= 1 MiB f32 at
    # lane=512 -> 2 arrays x 2 pipeline buffers = 4 MiB VMEM) and sized so the
    # grid has >= 2 steps for v7x megacore sharding.
    sub = min(512, _round_up(max(8, pl.cdiv(r, 2)), 8))
    sub = min(sub, _round_up(r, 8))

    out2d = pl.pallas_call(
        _sigmoid_kernel,
        out_shape=jax.ShapeDtypeStruct((r, lane), dtype),
        grid=(pl.cdiv(r, sub),),
        in_specs=[pl.BlockSpec((sub, lane), lambda i: (i, 0))],
        out_specs=pl.BlockSpec((sub, lane), lambda i: (i, 0)),
        compiler_params=pltpu.CompilerParams(
            dimension_semantics=("parallel",)),
        cost_estimate=_cost(n_elems, itemsize),
    )(x2d)
    return out2d.reshape(rows, n)


def init_propensity_param(list_size: int) -> jax.Array:
    """Deterministic init matching the PyTorch __init__:
    cat([tensor([[-1]]), ones(1, list_size)], dim=1) * 5
    """
    head = jnp.array([[-1.0]], dtype=jnp.float32)
    tail = jnp.ones((1, list_size), dtype=jnp.float32)
    return jnp.concatenate([head, tail], axis=1) * 5.0


if __name__ == "__main__":
    # The module's init is fully deterministic; key kept for interface parity.
    key = jax.random.PRNGKey(0)

    # Production-like shape: list_size = 8 -> parameter (1, 9).  Small path.
    list_size = 8
    param = init_propensity_param(list_size)          # (1, 9) float32
    out = jax.block_until_ready(propensity_forward(param))
    ref = jax.nn.sigmoid(param)
    assert out.shape == (1, list_size + 1)
    assert out.dtype == jnp.float32
    assert jnp.allclose(out, ref, atol=1e-6), (out, ref)

    # Exercise the sublane-dense 2-D large path once (n divisible by 512).
    big = jax.random.normal(key, (1, 65536), dtype=jnp.float32)
    out_big = jax.block_until_ready(propensity_forward(big))
    assert jnp.allclose(out_big, jax.nn.sigmoid(big), atol=1e-6)

    # Exercise the ragged-width fallback path once (n not a multiple of 128).
    rag = jax.random.normal(key, (1, 5001), dtype=jnp.float32)
    out_rag = jax.block_until_ready(propensity_forward(rag))
    assert jnp.allclose(out_rag, jax.nn.sigmoid(rag), atol=1e-6)

    print("KERNEL_OK")
</pallas_src>

<mosaic_0001>
module attributes {stable_mosaic.version = 11 : i64} {
  func.func @_sigmoid_kernel(%arg0: i32, %arg1: memref<1x9xf32, #tpu.memory_space<vmem>>, %arg2: memref<1x9xf32, #tpu.memory_space<vmem>>) attributes {dimension_semantics = [#tpu.dimension_semantics<arbitrary>], iteration_bounds = array<i64: 1>, scalar_prefetch = 0 : i64, scratch_operands = 0 : i64, tpu.core_type = #tpu.core_type<tc>, window_params = [{pipeline_mode = #tpu.pipeline_mode<synchronous>, transform_indices = @transform_0, window_bounds = array<i64: 1, 9>}, {pipeline_mode = #tpu.pipeline_mode<synchronous>, transform_indices = @transform_1, window_bounds = array<i64: 1, 9>}]} {
    %c0 = arith.constant 0 : index
    %c0_0 = arith.constant 0 : index
    %0 = vector.load %arg1[%c0, %c0_0] : memref<1x9xf32, #tpu.memory_space<vmem>>, vector<1x9xf32>
    %cst = arith.constant 5.000000e-01 : f32
    %1 = vector.broadcast %cst : f32 to vector<1x9xf32>
    %2 = arith.mulf %1, %0 : vector<1x9xf32>
    %3 = math.tanh %2 : vector<1x9xf32>
    %cst_1 = arith.constant 1.000000e+00 : f32
    %4 = vector.broadcast %cst_1 : f32 to vector<1x9xf32>
    %5 = arith.addf %3, %4 : vector<1x9xf32>
    %cst_2 = arith.constant 5.000000e-01 : f32
    %6 = vector.broadcast %cst_2 : f32 to vector<1x9xf32>
    %7 = arith.mulf %6, %5 : vector<1x9xf32>
    %c0_3 = arith.constant 0 : index
    %c0_4 = arith.constant 0 : index
    %8 = vector.load %arg2[%c0_3, %c0_4] : memref<1x9xf32, #tpu.memory_space<vmem>>, vector<1x9xf32>
    tpu.vector_store %arg2[%c0_3, %c0_4], %7 {strides = array<i32>} : memref<1x9xf32, #tpu.memory_space<vmem>>, vector<1x9xf32>,
    return
  }
  func.func @transform_0(%arg0: i32) -> (i32, i32) {
    %c0_i32 = arith.constant 0 : i32
    %c0_i32_0 = arith.constant 0 : i32
    %c0_i32_1 = arith.constant 0 : i32
    return %c0_i32, %c0_i32_0 : i32, i32
  }
  func.func @transform_1(%arg0: i32) -> (i32, i32) {
    %c0_i32 = arith.constant 0 : i32
    %c0_i32_0 = arith.constant 0 : i32
    %c0_i32_1 = arith.constant 0 : i32
    return %c0_i32, %c0_i32_0 : i32, i32
  }
}

</mosaic_0001>

<bundles_post_ra>
// kernel: tpu_custom_call.1
= control target key start
LH: loop header
LB: loop body
LE: loop exit
PB: predicated region body
PF: predicated region fallthrough
CT: control target
= control target key end

     0   :  { %6 = vsyncpa [#allocation3], 0  ;;  %s121_s0 = inlined_call_operand.hbm [shape: f32[1,9], index: 0, kind: input, shape index: {}]   ;;  %s122_s1 = inlined_call_operand.hbm [shape: f32[1,9], index: 1, kind: output, shape index: {}]  }
   0x1   :  { %7 = vsyncpa [#allocation4], 0  ;;  %s13_s8 = sshll.u32 %s121_s0, 4  ;;  %s103_s9 = smov [#allocation2]   ;;  %s14_s8 = int_to_ptr.hbm [resolvable:$true] %s13_s8 }
   0x2   :  { %s15_s10 = sshll.u32 %s103_s9, 4  ;;  %s16_s10 = int_to_ptr.vmem [resolvable:$true] %s15_s10 }
   0x3   :  { %18 = dma.hbm_to_vmem [thread:$0]  %s14_s8, 16, %s16_s10, [#allocation3]  }
   0x4   :  { %99 = dma.done.wait [#allocation3], 16  }
   0x5   :  { %100 = vsyncadd [#allocation3], 4294967280  ;;  %v23_v0 = vld [vmem:[#allocation2] sm:$0x1]  ;;  %s104_s11 = smov [#allocation5]   ;;  %s37_s15 = sshll.u32 %s122_s1, 4  ;;  %s38_s15 = int_to_ptr.hbm [resolvable:$true] %s37_s15 }
   0x6   :  { %v24_v1 = vmul.f32 0.5, %v23_v0  ;;  %s35_s12 = sshll.u32 %s104_s11, 4  ;;  %vm28_vm0 = vcmask 65536   ;;  %s36_s12 = int_to_ptr.vmem [resolvable:$true] %s35_s12 }
   0x8   :  { %49 = vtanh.f32 %v24_v1 }
   0xe   :  { %v50_v2 = vpop.eup %49 }
   0xf   :  { %v26_v3 = vadd.f32 1.0, %v50_v2 }
  0x11   :  { %v27_v4 = vmul.f32 0.5, %v26_v3 }
  0x13   :  { %29 = vst.msk [vmem:[#allocation5] sm:$0x1] %vm28_vm0, %v27_v4 }
  0x14   :  { %40 = dma.vmem_to_hbm [thread:$0]  %s36_s12, 16, %s38_s15, [#allocation4]  }
  0x15   :  { %101 = dma.done.wait [#allocation4], 16  }
  0x16   :  { %102 = vsyncadd [#allocation4], 4294967280 }
  0x17   :  { %45 = vsyncpa [#allocation3], 1 }
  0x18   :  { %46 = vsyncpa [#allocation4], 1 }

</bundles_post_ra>
